<compile_context>
chip_gen: v5e
topology: v5e:2x2
jax: 0.10.0
libtpu: 0.0.40
codegen_flags: <defaults>
</compile_context>

<pallas_src>
import functools

import jax
import jax.numpy as jnp
from jax import lax
from jax.experimental import pallas as pl
from jax.experimental.pallas import tpu as pltpu


# ------------------------------------------------------------------- kernel --

def _res_block_kernel(x_ref, mask_ref, w1_ref, b1_ref, w2a_ref, w2b_ref, b2_ref,
                      w3_ref, b3_ref, fc1w_ref, fc1b_ref, fc2w_ref, fc2b_ref,
                      o_ref, *, img_w, hw, images_per_step, compute_dtype):
    """Whole ResBlock for `images_per_step` images per grid step, all on-chip.

    Layout: channels on sublanes, flattened H*W on lanes (lane-dense stores).
       x_ref:    (TB, Cin, HW)
       mask_ref: (9, HW)      border-validity masks for the 3x3 taps
       w1_ref:   (R, Cin)     block-1 1x1 pair + BN folded,   b1_ref: (R, 1)
       w2a_ref:  (9, R, R)    first  3x3 conv of block 2 (per-tap weights)
       w2b_ref:  (9, R, R)    second 3x3 conv of block 2 (BN folded), b2_ref: (R, 1)
       w3_ref:   (Cout, R)    block-3 1x1 pair + BN folded,   b3_ref: (Cout, 1)
       fc1*/fc2*: SE squeeze-excite linears (left-multiply orientation)
       o_ref:    (TB, Cout, HW)
    """

    def mm(a, b):
        # MXU matmul; operands optionally cast to bf16 (v6e/v7x), f32 accumulate.
        return jnp.dot(a.astype(compute_dtype), b.astype(compute_dtype),
                       preferred_element_type=jnp.float32)

    masks = mask_ref[...]                               # (9, HW)
    mask_rows = [masks[t:t + 1, :] for t in range(9)]   # hoisted (1, HW) rows
    tap_offsets = [dy * img_w + dx for dy in (-1, 0, 1) for dx in (-1, 0, 1)]

    w1, b1 = w1_ref[...], b1_ref[...]
    w2a, w2b, b2 = w2a_ref[...], w2b_ref[...], b2_ref[...]
    w3, b3 = w3_ref[...], b3_ref[...]
    fc1w, fc1b = fc1w_ref[...], fc1b_ref[...]
    fc2w, fc2b = fc2w_ref[...], fc2b_ref[...]

    def conv3x3(v, w_taps):
        # v: (R, HW).  Tap (dy, dx) needs v[:, s + dy*W + dx] with zero padding at
        # the image border: a lane roll (XLU) + 0/1 border mask, then a tiny
        # (R,R)@(R,HW) MXU matmul accumulated over the 9 taps.  At valid
        # positions the rolled source index is exact; invalid positions (where
        # the roll wraps / crosses a row) are zeroed by the mask.
        acc = None
        for t, off in enumerate(tap_offsets):
            if off == 0:
                piece = v                                # centre tap: no shift, all valid
            else:
                piece = pltpu.roll(v, (-off) % hw, axis=1) * mask_rows[t]
            term = mm(w_taps[t], piece)
            acc = term if acc is None else acc + term
        return acc

    for b in range(images_per_step):                     # static unroll
        x = x_ref[b]                                                    # (Cin, HW)

        # Block 1: relu(bn(c2(c1(x)))) -- 1x1 pair + BN folded into one matmul.
        f = jnp.maximum(mm(w1, x) + b1, 0.0)                            # (R, HW)

        # Block 2: relu(bn(c2(c1(f)))) with 3x3 convs (BN folded into 2nd conv).
        g = conv3x3(f, w2a)
        g = jnp.maximum(conv3x3(g, w2b) + b2, 0.0)                      # (R, HW)

        # Block 3: bn(c2(c1(g))) folded into one matmul (no ReLU before SE).
        h = mm(w3, g) + b3                                              # (Cout, HW)

        # SE block: gate = sigmoid(fc2(relu(fc1(global_avg_pool(h)))))
        pooled = jnp.mean(h, axis=1, keepdims=True)                     # (Cout, 1)
        s = jnp.maximum(mm(fc1w, pooled) + fc1b, 0.0)                   # (Mid, 1)
        z = mm(fc2w, s) + fc2b                                          # (Cout, 1)
        gate = pl.reciprocal(1.0 + jnp.exp(-z))          # sigmoid via EUP exp + recip

        # SE scale + residual add + final ReLU; lane-dense (Cout, 256) store.
        o_ref[b] = jnp.maximum(h * gate + x, 0.0).astype(o_ref.dtype)


# --------------------------------------------------- trace-time preparation --

def _make_border_masks(H, W):
    """(9, H*W) 0/1 masks: mask[t, y*W+x] = 1 iff the tap's source pixel
    (y+dy, x+dx) lies inside the image; tap order t = (dy+1)*3 + (dx+1)."""
    hw = H * W
    r = jnp.arange(hw, dtype=jnp.int32)
    y, x = r // W, r % W
    rows = []
    for dy in (-1, 0, 1):
        for dx in (-1, 0, 1):
            valid = (y + dy >= 0) & (y + dy < H) & (x + dx >= 0) & (x + dx < W)
            rows.append(valid.astype(jnp.float32))
    return jnp.stack(rows, axis=0)


def _fold_params(p):
    """Fold the 1x1 conv pairs + BN into single (Cout, Cin) matmuls, fold block-2's
    BN into its second conv's weights, and shape everything for left-multiplication
    of channel-major (C, HW) activations."""

    def fold_1x1_pair(w_a, w_b, scale, shift):
        wa = w_a[:, :, 0, 0]                                    # (Cmid, Cin)
        wb = w_b[:, :, 0, 0]                                    # (Cout, Cmid)
        w = jnp.matmul(wb, wa, precision=lax.Precision.HIGHEST)
        return w * scale.reshape(-1, 1), shift.reshape(-1, 1)   # (Cout,Cin), (Cout,1)

    def conv3x3_taps(w_oihw, scale=None):
        o, i = w_oihw.shape[:2]
        w = jnp.transpose(w_oihw, (2, 3, 0, 1)).reshape(9, o, i)  # [t, o, i], t = kh*3+kw
        if scale is not None:
            w = w * scale.reshape(1, -1, 1)
        return w

    w1, b1 = fold_1x1_pair(p['b1_w1'], p['b1_w2'], p['b1_scale'], p['b1_shift'])
    w3, b3 = fold_1x1_pair(p['b3_w1'], p['b3_w2'], p['b3_scale'], p['b3_shift'])
    w2a = conv3x3_taps(p['b2_w1'])
    w2b = conv3x3_taps(p['b2_w2'], p['b2_scale'])
    b2 = p['b2_shift'].reshape(-1, 1)

    fc1w, fc1b = p['fc1_w'], p['fc1_b'].reshape(-1, 1)           # (Mid, Cout), (Mid, 1)
    fc2w, fc2b = p['fc2_w'], p['fc2_b'].reshape(-1, 1)           # (Cout, Mid), (Cout, 1)
    return w1, b1, w2a, w2b, b2, w3, b3, fc1w, fc1b, fc2w, fc2b


# ------------------------------------------------------------------ forward --

def res_block_forward(x_nchw, p, *, images_per_step=1, compute_dtype=jnp.float32):
    B, Cin, H, W = x_nchw.shape
    R = p['b1_w1'].shape[0]
    Cout = p['b3_w2'].shape[0]
    Mid = p['fc1_w'].shape[0]
    assert Cin == Cout, "residual add requires out_channels == in_channels"
    assert B % images_per_step == 0
    HW = H * W
    TB = images_per_step

    # Channel-major layout: NCHW is already (B, C, H*W) after a pure reshape
    # (no HBM transpose pass on either side of the kernel).
    x2 = x_nchw.astype(jnp.float32).reshape(B, Cin, HW)
    masks = _make_border_masks(H, W)
    (w1, b1, w2a, w2b, b2, w3, b3, fc1w, fc1b, fc2w, fc2b) = _fold_params(p)

    kernel = functools.partial(_res_block_kernel, img_w=W, hw=HW,
                               images_per_step=TB, compute_dtype=compute_dtype)
    const2 = lambda i: (0, 0)
    const3 = lambda i: (0, 0, 0)

    out = pl.pallas_call(
        kernel,
        out_shape=jax.ShapeDtypeStruct((B, Cout, HW), jnp.float32),
        grid=(B // TB,),
        in_specs=[
            pl.BlockSpec((TB, Cin, HW), lambda i: (i, 0, 0)),   # x
            pl.BlockSpec((9, HW), const2),                      # 3x3 border masks
            pl.BlockSpec((R, Cin), const2),                     # w1 folded
            pl.BlockSpec((R, 1), const2),                       # b1 folded
            pl.BlockSpec((9, R, R), const3),                    # block-2 conv a (per tap)
            pl.BlockSpec((9, R, R), const3),                    # block-2 conv b (BN folded)
            pl.BlockSpec((R, 1), const2),                       # b2 folded
            pl.BlockSpec((Cout, R), const2),                    # w3 folded
            pl.BlockSpec((Cout, 1), const2),                    # b3 folded
            pl.BlockSpec((Mid, Cout), const2),                  # SE fc1 weight
            pl.BlockSpec((Mid, 1), const2),                     # SE fc1 bias
            pl.BlockSpec((Cout, Mid), const2),                  # SE fc2 weight
            pl.BlockSpec((Cout, 1), const2),                    # SE fc2 bias
        ],
        out_specs=pl.BlockSpec((TB, Cout, HW), lambda i: (i, 0, 0)),
        compiler_params=pltpu.CompilerParams(
            dimension_semantics=("parallel",)),
    )(x2, masks, w1, b1, w2a, w2b, b2, w3, b3, fc1w, fc1b, fc2w, fc2b)

    return out.reshape(B, Cout, H, W)


# ------------------------------------------------------------------- params --

def init_params(key, in_channels, out_channels):
    res = in_channels // 4
    se_mid = out_channels // 8
    ks = iter(jax.random.split(key, 32))

    def conv_w(o, i, k):
        return jax.random.normal(next(ks), (o, i, k, k), jnp.float32) / jnp.sqrt(i * k * k)

    def bn(c):
        gamma = 1.0 + 0.1 * jax.random.normal(next(ks), (c,), jnp.float32)
        beta = 0.1 * jax.random.normal(next(ks), (c,), jnp.float32)
        mean = 0.1 * jax.random.normal(next(ks), (c,), jnp.float32)
        var = 1.0 + 0.1 * jnp.abs(jax.random.normal(next(ks), (c,), jnp.float32))
        scale = gamma / jnp.sqrt(var + 1e-5)
        shift = beta - mean * scale
        return scale.reshape(1, c), shift.reshape(1, c)

    p = {}
    # ConvBlock c1 (1x1, pad 0): inferred conv c1 in->res, conv c2 res->res, BN(res)
    p['b1_w1'] = conv_w(res, in_channels, 1)
    p['b1_w2'] = conv_w(res, res, 1)
    p['b1_scale'], p['b1_shift'] = bn(res)
    # ConvBlock c2 (3x3, pad 1)
    p['b2_w1'] = conv_w(res, res, 3)
    p['b2_w2'] = conv_w(res, res, 3)
    p['b2_scale'], p['b2_shift'] = bn(res)
    # ConvBlock c3 (1x1, pad 0)
    p['b3_w1'] = conv_w(out_channels, res, 1)
    p['b3_w2'] = conv_w(out_channels, out_channels, 1)
    p['b3_scale'], p['b3_shift'] = bn(out_channels)
    # SE block linears (PyTorch layout: (out_features, in_features))
    p['fc1_w'] = jax.random.normal(next(ks), (se_mid, out_channels), jnp.float32) / jnp.sqrt(out_channels)
    p['fc1_b'] = 0.1 * jax.random.normal(next(ks), (se_mid,), jnp.float32)
    p['fc2_w'] = jax.random.normal(next(ks), (out_channels, se_mid), jnp.float32) / jnp.sqrt(se_mid)
    p['fc2_b'] = 0.1 * jax.random.normal(next(ks), (out_channels,), jnp.float32)
    return p


# ---------------------------------------------------------- pure-JAX reference

def res_block_reference(x_nchw, p):
    with jax.default_matmul_precision('float32'):
        x = jnp.transpose(x_nchw, (0, 2, 3, 1)).astype(jnp.float32)

        def conv(y, w_oihw, pad):
            w = jnp.transpose(w_oihw, (2, 3, 1, 0))
            return lax.conv_general_dilated(
                y, w, (1, 1), [(pad, pad), (pad, pad)],
                dimension_numbers=('NHWC', 'HWIO', 'NHWC'),
                precision=lax.Precision.HIGHEST)

        def block(y, w1, w2, scale, shift, pad):
            y = conv(conv(y, w1, pad), w2, pad)
            return y * scale.reshape(1, 1, 1, -1) + shift.reshape(1, 1, 1, -1)

        f = jax.nn.relu(block(x, p['b1_w1'], p['b1_w2'], p['b1_scale'], p['b1_shift'], 0))
        f = jax.nn.relu(block(f, p['b2_w1'], p['b2_w2'], p['b2_scale'], p['b2_shift'], 1))
        f = block(f, p['b3_w1'], p['b3_w2'], p['b3_scale'], p['b3_shift'], 0)
        pooled = jnp.mean(f, axis=(1, 2))
        h = jax.nn.relu(pooled @ p['fc1_w'].T + p['fc1_b'])
        gate = jax.nn.sigmoid(h @ p['fc2_w'].T + p['fc2_b'])
        out = jax.nn.relu(f * gate[:, None, None, :] + x)
        return jnp.transpose(out, (0, 3, 1, 2))


# --------------------------------------------------------------------- main --

if __name__ == "__main__":
    B, C, H, W = 2, 16, 16, 16        # residual add requires out_channels == in_channels
    key = jax.random.PRNGKey(0)
    kx, kp = jax.random.split(key)
    x = jax.random.normal(kx, (B, C, H, W), jnp.float32)
    params = init_params(kp, C, C)

    # images_per_step=1 keeps grid=(2,) so both v7x TensorCores get work; on
    # single-TC v5e/v6e bump it up (divides B) to amortise grid-step overhead.
    # On v6e/v7x set compute_dtype=jnp.bfloat16 for MXU speed (loosen tolerance).
    fwd = jax.jit(functools.partial(res_block_forward,
                                    images_per_step=1,
                                    compute_dtype=jnp.float32))
    out = jax.block_until_ready(fwd(x, params))
    assert out.shape == (B, C, H, W)

    ref = res_block_reference(x, params)
    max_err = float(jnp.max(jnp.abs(out - ref)))
    assert max_err < 2e-3, f"mismatch vs reference: max abs err {max_err}"

    print("KERNEL_OK")
</pallas_src>

<mosaic_0001>
module attributes {stable_mosaic.version = 11 : i64} {
  func.func @_res_block_kernel(%arg0: i32, %arg1: memref<1x16x256xf32, #tpu.memory_space<vmem>>, %arg2: memref<9x256xf32, #tpu.memory_space<vmem>>, %arg3: memref<4x16xf32, #tpu.memory_space<vmem>>, %arg4: memref<4x1xf32, #tpu.memory_space<vmem>>, %arg5: memref<9x4x4xf32, #tpu.memory_space<vmem>>, %arg6: memref<9x4x4xf32, #tpu.memory_space<vmem>>, %arg7: memref<4x1xf32, #tpu.memory_space<vmem>>, %arg8: memref<16x4xf32, #tpu.memory_space<vmem>>, %arg9: memref<16x1xf32, #tpu.memory_space<vmem>>, %arg10: memref<2x16xf32, #tpu.memory_space<vmem>>, %arg11: memref<2x1xf32, #tpu.memory_space<vmem>>, %arg12: memref<16x2xf32, #tpu.memory_space<vmem>>, %arg13: memref<16x1xf32, #tpu.memory_space<vmem>>, %arg14: memref<1x16x256xf32, #tpu.memory_space<vmem>>) attributes {dimension_semantics = [#tpu.dimension_semantics<parallel>], iteration_bounds = array<i64: 2>, scalar_prefetch = 0 : i64, scratch_operands = 0 : i64, tpu.core_type = #tpu.core_type<tc>, window_params = [{transform_indices = @transform_0, window_bounds = array<i64: 1, 16, 256>}, {pipeline_mode = #tpu.pipeline_mode<synchronous>, transform_indices = @transform_1, window_bounds = array<i64: 9, 256>}, {pipeline_mode = #tpu.pipeline_mode<synchronous>, transform_indices = @transform_2, window_bounds = array<i64: 4, 16>}, {pipeline_mode = #tpu.pipeline_mode<synchronous>, transform_indices = @transform_3, window_bounds = array<i64: 4, 1>}, {pipeline_mode = #tpu.pipeline_mode<synchronous>, transform_indices = @transform_4, window_bounds = array<i64: 9, 4, 4>}, {pipeline_mode = #tpu.pipeline_mode<synchronous>, transform_indices = @transform_5, window_bounds = array<i64: 9, 4, 4>}, {pipeline_mode = #tpu.pipeline_mode<synchronous>, transform_indices = @transform_6, window_bounds = array<i64: 4, 1>}, {pipeline_mode = #tpu.pipeline_mode<synchronous>, transform_indices = @transform_7, window_bounds = array<i64: 16, 4>}, {pipeline_mode = #tpu.pipeline_mode<synchronous>, transform_indices = @transform_8, window_bounds = array<i64: 16, 1>}, {pipeline_mode = #tpu.pipeline_mode<synchronous>, transform_indices = @transform_9, window_bounds = array<i64: 2, 16>}, {pipeline_mode = #tpu.pipeline_mode<synchronous>, transform_indices = @transform_10, window_bounds = array<i64: 2, 1>}, {pipeline_mode = #tpu.pipeline_mode<synchronous>, transform_indices = @transform_11, window_bounds = array<i64: 16, 2>}, {pipeline_mode = #tpu.pipeline_mode<synchronous>, transform_indices = @transform_12, window_bounds = array<i64: 16, 1>}, {transform_indices = @transform_13, window_bounds = array<i64: 1, 16, 256>}]} {
    %c0 = arith.constant 0 : index
    %c0_0 = arith.constant 0 : index
    %0 = vector.load %arg2[%c0, %c0_0] : memref<9x256xf32, #tpu.memory_space<vmem>>, vector<9x256xf32>
    %1 = vector.extract_strided_slice %0 {offsets = [0, 0], sizes = [1, 256], strides = [1, 1]} : vector<9x256xf32> to vector<1x256xf32>
    %2 = vector.extract_strided_slice %0 {offsets = [1, 0], sizes = [1, 256], strides = [1, 1]} : vector<9x256xf32> to vector<1x256xf32>
    %3 = vector.extract_strided_slice %0 {offsets = [2, 0], sizes = [1, 256], strides = [1, 1]} : vector<9x256xf32> to vector<1x256xf32>
    %4 = vector.extract_strided_slice %0 {offsets = [3, 0], sizes = [1, 256], strides = [1, 1]} : vector<9x256xf32> to vector<1x256xf32>
    %5 = vector.extract_strided_slice %0 {offsets = [5, 0], sizes = [1, 256], strides = [1, 1]} : vector<9x256xf32> to vector<1x256xf32>
    %6 = vector.extract_strided_slice %0 {offsets = [6, 0], sizes = [1, 256], strides = [1, 1]} : vector<9x256xf32> to vector<1x256xf32>
    %7 = vector.extract_strided_slice %0 {offsets = [7, 0], sizes = [1, 256], strides = [1, 1]} : vector<9x256xf32> to vector<1x256xf32>
    %8 = vector.extract_strided_slice %0 {offsets = [8, 0], sizes = [1, 256], strides = [1, 1]} : vector<9x256xf32> to vector<1x256xf32>
    %c0_1 = arith.constant 0 : index
    %c0_2 = arith.constant 0 : index
    %9 = vector.load %arg3[%c0_1, %c0_2] : memref<4x16xf32, #tpu.memory_space<vmem>>, vector<4x16xf32>
    %c0_3 = arith.constant 0 : index
    %c0_4 = arith.constant 0 : index
    %10 = vector.load %arg4[%c0_3, %c0_4] : memref<4x1xf32, #tpu.memory_space<vmem>>, vector<4x1xf32>
    %c0_5 = arith.constant 0 : index
    %c0_6 = arith.constant 0 : index
    %c0_7 = arith.constant 0 : index
    %11 = vector.load %arg5[%c0_5, %c0_6, %c0_7] : memref<9x4x4xf32, #tpu.memory_space<vmem>>, vector<9x4x4xf32>
    %c0_8 = arith.constant 0 : index
    %c0_9 = arith.constant 0 : index
    %c0_10 = arith.constant 0 : index
    %12 = vector.load %arg6[%c0_8, %c0_9, %c0_10] : memref<9x4x4xf32, #tpu.memory_space<vmem>>, vector<9x4x4xf32>
    %c0_11 = arith.constant 0 : index
    %c0_12 = arith.constant 0 : index
    %13 = vector.load %arg7[%c0_11, %c0_12] : memref<4x1xf32, #tpu.memory_space<vmem>>, vector<4x1xf32>
    %c0_13 = arith.constant 0 : index
    %c0_14 = arith.constant 0 : index
    %14 = vector.load %arg8[%c0_13, %c0_14] : memref<16x4xf32, #tpu.memory_space<vmem>>, vector<16x4xf32>
    %c0_15 = arith.constant 0 : index
    %c0_16 = arith.constant 0 : index
    %15 = vector.load %arg9[%c0_15, %c0_16] : memref<16x1xf32, #tpu.memory_space<vmem>>, vector<16x1xf32>
    %c0_17 = arith.constant 0 : index
    %c0_18 = arith.constant 0 : index
    %16 = vector.load %arg10[%c0_17, %c0_18] : memref<2x16xf32, #tpu.memory_space<vmem>>, vector<2x16xf32>
    %c0_19 = arith.constant 0 : index
    %c0_20 = arith.constant 0 : index
    %17 = vector.load %arg11[%c0_19, %c0_20] : memref<2x1xf32, #tpu.memory_space<vmem>>, vector<2x1xf32>
    %c0_21 = arith.constant 0 : index
    %c0_22 = arith.constant 0 : index
    %18 = vector.load %arg12[%c0_21, %c0_22] : memref<16x2xf32, #tpu.memory_space<vmem>>, vector<16x2xf32>
    %c0_23 = arith.constant 0 : index
    %c0_24 = arith.constant 0 : index
    %19 = vector.load %arg13[%c0_23, %c0_24] : memref<16x1xf32, #tpu.memory_space<vmem>>, vector<16x1xf32>
    %c0_25 = arith.constant 0 : index
    %c0_26 = arith.constant 0 : index
    %c0_27 = arith.constant 0 : index
    %20 = vector.load %arg1[%c0_25, %c0_26, %c0_27] : memref<1x16x256xf32, #tpu.memory_space<vmem>>, vector<1x16x256xf32>
    %21 = vector.shape_cast %20 : vector<1x16x256xf32> to vector<16x256xf32>
    %cst = arith.constant dense<0.000000e+00> : vector<4x256xf32>
    %22 = tpu.matmul %9, %21, %cst {dimension_numbers = #tpu.dot_dimension_numbers<[1], [0], [0], [1], [0, 0, 1, 1], [], []>} : vector<4x16xf32>, vector<16x256xf32>, vector<4x256xf32> -> vector<4x256xf32>
    %23 = vector.broadcast %10 : vector<4x1xf32> to vector<4x256xf32>
    %24 = arith.addf %22, %23 : vector<4x256xf32>
    %cst_28 = arith.constant 0.000000e+00 : f32
    %25 = vector.broadcast %cst_28 : f32 to vector<4x256xf32>
    %26 = arith.maximumf %24, %25 : vector<4x256xf32>
    %c17_i32 = arith.constant 17 : i32
    %27 = tpu.dynamic_rotate %26 by %c17_i32 dim 1 : vector<4x256xf32>, i32 -> vector<4x256xf32>
    %28 = vector.broadcast %1 : vector<1x256xf32> to vector<4x256xf32>
    %29 = arith.mulf %27, %28 : vector<4x256xf32>
    %30 = vector.extract_strided_slice %11 {offsets = [0, 0, 0], sizes = [1, 4, 4], strides = [1, 1, 1]} : vector<9x4x4xf32> to vector<1x4x4xf32>
    %31 = vector.shape_cast %30 : vector<1x4x4xf32> to vector<4x4xf32>
    %cst_29 = arith.constant dense<0.000000e+00> : vector<4x256xf32>
    %32 = tpu.matmul %31, %29, %cst_29 {dimension_numbers = #tpu.dot_dimension_numbers<[1], [0], [0], [1], [0, 0, 1, 1], [], []>} : vector<4x4xf32>, vector<4x256xf32>, vector<4x256xf32> -> vector<4x256xf32>
    %c16_i32 = arith.constant 16 : i32
    %33 = tpu.dynamic_rotate %26 by %c16_i32 dim 1 : vector<4x256xf32>, i32 -> vector<4x256xf32>
    %34 = vector.broadcast %2 : vector<1x256xf32> to vector<4x256xf32>
    %35 = arith.mulf %33, %34 : vector<4x256xf32>
    %36 = vector.extract_strided_slice %11 {offsets = [1, 0, 0], sizes = [1, 4, 4], strides = [1, 1, 1]} : vector<9x4x4xf32> to vector<1x4x4xf32>
    %37 = vector.shape_cast %36 : vector<1x4x4xf32> to vector<4x4xf32>
    %cst_30 = arith.constant dense<0.000000e+00> : vector<4x256xf32>
    %38 = tpu.matmul %37, %35, %cst_30 {dimension_numbers = #tpu.dot_dimension_numbers<[1], [0], [0], [1], [0, 0, 1, 1], [], []>} : vector<4x4xf32>, vector<4x256xf32>, vector<4x256xf32> -> vector<4x256xf32>
    %39 = arith.addf %32, %38 : vector<4x256xf32>
    %c15_i32 = arith.constant 15 : i32
    %40 = tpu.dynamic_rotate %26 by %c15_i32 dim 1 : vector<4x256xf32>, i32 -> vector<4x256xf32>
    %41 = vector.broadcast %3 : vector<1x256xf32> to vector<4x256xf32>
    %42 = arith.mulf %40, %41 : vector<4x256xf32>
    %43 = vector.extract_strided_slice %11 {offsets = [2, 0, 0], sizes = [1, 4, 4], strides = [1, 1, 1]} : vector<9x4x4xf32> to vector<1x4x4xf32>
    %44 = vector.shape_cast %43 : vector<1x4x4xf32> to vector<4x4xf32>
    %cst_31 = arith.constant dense<0.000000e+00> : vector<4x256xf32>
    %45 = tpu.matmul %44, %42, %cst_31 {dimension_numbers = #tpu.dot_dimension_numbers<[1], [0], [0], [1], [0, 0, 1, 1], [], []>} : vector<4x4xf32>, vector<4x256xf32>, vector<4x256xf32> -> vector<4x256xf32>
    %46 = arith.addf %39, %45 : vector<4x256xf32>
    %c1_i32 = arith.constant 1 : i32
    %47 = tpu.dynamic_rotate %26 by %c1_i32 dim 1 : vector<4x256xf32>, i32 -> vector<4x256xf32>
    %48 = vector.broadcast %4 : vector<1x256xf32> to vector<4x256xf32>
    %49 = arith.mulf %47, %48 : vector<4x256xf32>
    %50 = vector.extract_strided_slice %11 {offsets = [3, 0, 0], sizes = [1, 4, 4], strides = [1, 1, 1]} : vector<9x4x4xf32> to vector<1x4x4xf32>
    %51 = vector.shape_cast %50 : vector<1x4x4xf32> to vector<4x4xf32>
    %cst_32 = arith.constant dense<0.000000e+00> : vector<4x256xf32>
    %52 = tpu.matmul %51, %49, %cst_32 {dimension_numbers = #tpu.dot_dimension_numbers<[1], [0], [0], [1], [0, 0, 1, 1], [], []>} : vector<4x4xf32>, vector<4x256xf32>, vector<4x256xf32> -> vector<4x256xf32>
    %53 = arith.addf %46, %52 : vector<4x256xf32>
    %54 = vector.extract_strided_slice %11 {offsets = [4, 0, 0], sizes = [1, 4, 4], strides = [1, 1, 1]} : vector<9x4x4xf32> to vector<1x4x4xf32>
    %55 = vector.shape_cast %54 : vector<1x4x4xf32> to vector<4x4xf32>
    %cst_33 = arith.constant dense<0.000000e+00> : vector<4x256xf32>
    %56 = tpu.matmul %55, %26, %cst_33 {dimension_numbers = #tpu.dot_dimension_numbers<[1], [0], [0], [1], [0, 0, 1, 1], [], []>} : vector<4x4xf32>, vector<4x256xf32>, vector<4x256xf32> -> vector<4x256xf32>
    %57 = arith.addf %53, %56 : vector<4x256xf32>
    %c255_i32 = arith.constant 255 : i32
    %58 = tpu.dynamic_rotate %26 by %c255_i32 dim 1 : vector<4x256xf32>, i32 -> vector<4x256xf32>
    %59 = vector.broadcast %5 : vector<1x256xf32> to vector<4x256xf32>
    %60 = arith.mulf %58, %59 : vector<4x256xf32>
    %61 = vector.extract_strided_slice %11 {offsets = [5, 0, 0], sizes = [1, 4, 4], strides = [1, 1, 1]} : vector<9x4x4xf32> to vector<1x4x4xf32>
    %62 = vector.shape_cast %61 : vector<1x4x4xf32> to vector<4x4xf32>
    %cst_34 = arith.constant dense<0.000000e+00> : vector<4x256xf32>
    %63 = tpu.matmul %62, %60, %cst_34 {dimension_numbers = #tpu.dot_dimension_numbers<[1], [0], [0], [1], [0, 0, 1, 1], [], []>} : vector<4x4xf32>, vector<4x256xf32>, vector<4x256xf32> -> vector<4x256xf32>
    %64 = arith.addf %57, %63 : vector<4x256xf32>
    %c241_i32 = arith.constant 241 : i32
    %65 = tpu.dynamic_rotate %26 by %c241_i32 dim 1 : vector<4x256xf32>, i32 -> vector<4x256xf32>
    %66 = vector.broadcast %6 : vector<1x256xf32> to vector<4x256xf32>
    %67 = arith.mulf %65, %66 : vector<4x256xf32>
    %68 = vector.extract_strided_slice %11 {offsets = [6, 0, 0], sizes = [1, 4, 4], strides = [1, 1, 1]} : vector<9x4x4xf32> to vector<1x4x4xf32>
    %69 = vector.shape_cast %68 : vector<1x4x4xf32> to vector<4x4xf32>
    %cst_35 = arith.constant dense<0.000000e+00> : vector<4x256xf32>
    %70 = tpu.matmul %69, %67, %cst_35 {dimension_numbers = #tpu.dot_dimension_numbers<[1], [0], [0], [1], [0, 0, 1, 1], [], []>} : vector<4x4xf32>, vector<4x256xf32>, vector<4x256xf32> -> vector<4x256xf32>
    %71 = arith.addf %64, %70 : vector<4x256xf32>
    %c240_i32 = arith.constant 240 : i32
    %72 = tpu.dynamic_rotate %26 by %c240_i32 dim 1 : vector<4x256xf32>, i32 -> vector<4x256xf32>
    %73 = vector.broadcast %7 : vector<1x256xf32> to vector<4x256xf32>
    %74 = arith.mulf %72, %73 : vector<4x256xf32>
    %75 = vector.extract_strided_slice %11 {offsets = [7, 0, 0], sizes = [1, 4, 4], strides = [1, 1, 1]} : vector<9x4x4xf32> to vector<1x4x4xf32>
    %76 = vector.shape_cast %75 : vector<1x4x4xf32> to vector<4x4xf32>
    %cst_36 = arith.constant dense<0.000000e+00> : vector<4x256xf32>
    %77 = tpu.matmul %76, %74, %cst_36 {dimension_numbers = #tpu.dot_dimension_numbers<[1], [0], [0], [1], [0, 0, 1, 1], [], []>} : vector<4x4xf32>, vector<4x256xf32>, vector<4x256xf32> -> vector<4x256xf32>
    %78 = arith.addf %71, %77 : vector<4x256xf32>
    %c239_i32 = arith.constant 239 : i32
    %79 = tpu.dynamic_rotate %26 by %c239_i32 dim 1 : vector<4x256xf32>, i32 -> vector<4x256xf32>
    %80 = vector.broadcast %8 : vector<1x256xf32> to vector<4x256xf32>
    %81 = arith.mulf %79, %80 : vector<4x256xf32>
    %82 = vector.extract_strided_slice %11 {offsets = [8, 0, 0], sizes = [1, 4, 4], strides = [1, 1, 1]} : vector<9x4x4xf32> to vector<1x4x4xf32>
    %83 = vector.shape_cast %82 : vector<1x4x4xf32> to vector<4x4xf32>
    %cst_37 = arith.constant dense<0.000000e+00> : vector<4x256xf32>
    %84 = tpu.matmul %83, %81, %cst_37 {dimension_numbers = #tpu.dot_dimension_numbers<[1], [0], [0], [1], [0, 0, 1, 1], [], []>} : vector<4x4xf32>, vector<4x256xf32>, vector<4x256xf32> -> vector<4x256xf32>
    %85 = arith.addf %78, %84 : vector<4x256xf32>
    %c17_i32_38 = arith.constant 17 : i32
    %86 = tpu.dynamic_rotate %85 by %c17_i32_38 dim 1 : vector<4x256xf32>, i32 -> vector<4x256xf32>
    %87 = vector.broadcast %1 : vector<1x256xf32> to vector<4x256xf32>
    %88 = arith.mulf %86, %87 : vector<4x256xf32>
    %89 = vector.extract_strided_slice %12 {offsets = [0, 0, 0], sizes = [1, 4, 4], strides = [1, 1, 1]} : vector<9x4x4xf32> to vector<1x4x4xf32>
    %90 = vector.shape_cast %89 : vector<1x4x4xf32> to vector<4x4xf32>
    %cst_39 = arith.constant dense<0.000000e+00> : vector<4x256xf32>
    %91 = tpu.matmul %90, %88, %cst_39 {dimension_numbers = #tpu.dot_dimension_numbers<[1], [0], [0], [1], [0, 0, 1, 1], [], []>} : vector<4x4xf32>, vector<4x256xf32>, vector<4x256xf32> -> vector<4x256xf32>
    %c16_i32_40 = arith.constant 16 : i32
    %92 = tpu.dynamic_rotate %85 by %c16_i32_40 dim 1 : vector<4x256xf32>, i32 -> vector<4x256xf32>
    %93 = vector.broadcast %2 : vector<1x256xf32> to vector<4x256xf32>
    %94 = arith.mulf %92, %93 : vector<4x256xf32>
    %95 = vector.extract_strided_slice %12 {offsets = [1, 0, 0], sizes = [1, 4, 4], strides = [1, 1, 1]} : vector<9x4x4xf32> to vector<1x4x4xf32>
    %96 = vector.shape_cast %95 : vector<1x4x4xf32> to vector<4x4xf32>
    %cst_41 = arith.constant dense<0.000000e+00> : vector<4x256xf32>
    %97 = tpu.matmul %96, %94, %cst_41 {dimension_numbers = #tpu.dot_dimension_numbers<[1], [0], [0], [1], [0, 0, 1, 1], [], []>} : vector<4x4xf32>, vector<4x256xf32>, vector<4x256xf32> -> vector<4x256xf32>
    %98 = arith.addf %91, %97 : vector<4x256xf32>
    %c15_i32_42 = arith.constant 15 : i32
    %99 = tpu.dynamic_rotate %85 by %c15_i32_42 dim 1 : vector<4x256xf32>, i32 -> vector<4x256xf32>
    %100 = vector.broadcast %3 : vector<1x256xf32> to vector<4x256xf32>
    %101 = arith.mulf %99, %100 : vector<4x256xf32>
    %102 = vector.extract_strided_slice %12 {offsets = [2, 0, 0], sizes = [1, 4, 4], strides = [1, 1, 1]} : vector<9x4x4xf32> to vector<1x4x4xf32>
    %103 = vector.shape_cast %102 : vector<1x4x4xf32> to vector<4x4xf32>
    %cst_43 = arith.constant dense<0.000000e+00> : vector<4x256xf32>
    %104 = tpu.matmul %103, %101, %cst_43 {dimension_numbers = #tpu.dot_dimension_numbers<[1], [0], [0], [1], [0, 0, 1, 1], [], []>} : vector<4x4xf32>, vector<4x256xf32>, vector<4x256xf32> -> vector<4x256xf32>
    %105 = arith.addf %98, %104 : vector<4x256xf32>
    %c1_i32_44 = arith.constant 1 : i32
    %106 = tpu.dynamic_rotate %85 by %c1_i32_44 dim 1 : vector<4x256xf32>, i32 -> vector<4x256xf32>
    %107 = vector.broadcast %4 : vector<1x256xf32> to vector<4x256xf32>
    %108 = arith.mulf %106, %107 : vector<4x256xf32>
    %109 = vector.extract_strided_slice %12 {offsets = [3, 0, 0], sizes = [1, 4, 4], strides = [1, 1, 1]} : vector<9x4x4xf32> to vector<1x4x4xf32>
    %110 = vector.shape_cast %109 : vector<1x4x4xf32> to vector<4x4xf32>
    %cst_45 = arith.constant dense<0.000000e+00> : vector<4x256xf32>
    %111 = tpu.matmul %110, %108, %cst_45 {dimension_numbers = #tpu.dot_dimension_numbers<[1], [0], [0], [1], [0, 0, 1, 1], [], []>} : vector<4x4xf32>, vector<4x256xf32>, vector<4x256xf32> -> vector<4x256xf32>
    %112 = arith.addf %105, %111 : vector<4x256xf32>
    %113 = vector.extract_strided_slice %12 {offsets = [4, 0, 0], sizes = [1, 4, 4], strides = [1, 1, 1]} : vector<9x4x4xf32> to vector<1x4x4xf32>
    %114 = vector.shape_cast %113 : vector<1x4x4xf32> to vector<4x4xf32>
    %cst_46 = arith.constant dense<0.000000e+00> : vector<4x256xf32>
    %115 = tpu.matmul %114, %85, %cst_46 {dimension_numbers = #tpu.dot_dimension_numbers<[1], [0], [0], [1], [0, 0, 1, 1], [], []>} : vector<4x4xf32>, vector<4x256xf32>, vector<4x256xf32> -> vector<4x256xf32>
    %116 = arith.addf %112, %115 : vector<4x256xf32>
    %c255_i32_47 = arith.constant 255 : i32
    %117 = tpu.dynamic_rotate %85 by %c255_i32_47 dim 1 : vector<4x256xf32>, i32 -> vector<4x256xf32>
    %118 = vector.broadcast %5 : vector<1x256xf32> to vector<4x256xf32>
    %119 = arith.mulf %117, %118 : vector<4x256xf32>
    %120 = vector.extract_strided_slice %12 {offsets = [5, 0, 0], sizes = [1, 4, 4], strides = [1, 1, 1]} : vector<9x4x4xf32> to vector<1x4x4xf32>
    %121 = vector.shape_cast %120 : vector<1x4x4xf32> to vector<4x4xf32>
    %cst_48 = arith.constant dense<0.000000e+00> : vector<4x256xf32>
    %122 = tpu.matmul %121, %119, %cst_48 {dimension_numbers = #tpu.dot_dimension_numbers<[1], [0], [0], [1], [0, 0, 1, 1], [], []>} : vector<4x4xf32>, vector<4x256xf32>, vector<4x256xf32> -> vector<4x256xf32>
    %123 = arith.addf %116, %122 : vector<4x256xf32>
    %c241_i32_49 = arith.constant 241 : i32
    %124 = tpu.dynamic_rotate %85 by %c241_i32_49 dim 1 : vector<4x256xf32>, i32 -> vector<4x256xf32>
    %125 = vector.broadcast %6 : vector<1x256xf32> to vector<4x256xf32>
    %126 = arith.mulf %124, %125 : vector<4x256xf32>
    %127 = vector.extract_strided_slice %12 {offsets = [6, 0, 0], sizes = [1, 4, 4], strides = [1, 1, 1]} : vector<9x4x4xf32> to vector<1x4x4xf32>
    %128 = vector.shape_cast %127 : vector<1x4x4xf32> to vector<4x4xf32>
    %cst_50 = arith.constant dense<0.000000e+00> : vector<4x256xf32>
    %129 = tpu.matmul %128, %126, %cst_50 {dimension_numbers = #tpu.dot_dimension_numbers<[1], [0], [0], [1], [0, 0, 1, 1], [], []>} : vector<4x4xf32>, vector<4x256xf32>, vector<4x256xf32> -> vector<4x256xf32>
    %130 = arith.addf %123, %129 : vector<4x256xf32>
    %c240_i32_51 = arith.constant 240 : i32
    %131 = tpu.dynamic_rotate %85 by %c240_i32_51 dim 1 : vector<4x256xf32>, i32 -> vector<4x256xf32>
    %132 = vector.broadcast %7 : vector<1x256xf32> to vector<4x256xf32>
    %133 = arith.mulf %131, %132 : vector<4x256xf32>
    %134 = vector.extract_strided_slice %12 {offsets = [7, 0, 0], sizes = [1, 4, 4], strides = [1, 1, 1]} : vector<9x4x4xf32> to vector<1x4x4xf32>
    %135 = vector.shape_cast %134 : vector<1x4x4xf32> to vector<4x4xf32>
    %cst_52 = arith.constant dense<0.000000e+00> : vector<4x256xf32>
    %136 = tpu.matmul %135, %133, %cst_52 {dimension_numbers = #tpu.dot_dimension_numbers<[1], [0], [0], [1], [0, 0, 1, 1], [], []>} : vector<4x4xf32>, vector<4x256xf32>, vector<4x256xf32> -> vector<4x256xf32>
    %137 = arith.addf %130, %136 : vector<4x256xf32>
    %c239_i32_53 = arith.constant 239 : i32
    %138 = tpu.dynamic_rotate %85 by %c239_i32_53 dim 1 : vector<4x256xf32>, i32 -> vector<4x256xf32>
    %139 = vector.broadcast %8 : vector<1x256xf32> to vector<4x256xf32>
    %140 = arith.mulf %138, %139 : vector<4x256xf32>
    %141 = vector.extract_strided_slice %12 {offsets = [8, 0, 0], sizes = [1, 4, 4], strides = [1, 1, 1]} : vector<9x4x4xf32> to vector<1x4x4xf32>
    %142 = vector.shape_cast %141 : vector<1x4x4xf32> to vector<4x4xf32>
    %cst_54 = arith.constant dense<0.000000e+00> : vector<4x256xf32>
    %143 = tpu.matmul %142, %140, %cst_54 {dimension_numbers = #tpu.dot_dimension_numbers<[1], [0], [0], [1], [0, 0, 1, 1], [], []>} : vector<4x4xf32>, vector<4x256xf32>, vector<4x256xf32> -> vector<4x256xf32>
    %144 = arith.addf %137, %143 : vector<4x256xf32>
    %145 = vector.broadcast %13 : vector<4x1xf32> to vector<4x256xf32>
    %146 = arith.addf %144, %145 : vector<4x256xf32>
    %cst_55 = arith.constant 0.000000e+00 : f32
    %147 = vector.broadcast %cst_55 : f32 to vector<4x256xf32>
    %148 = arith.maximumf %146, %147 : vector<4x256xf32>
    %cst_56 = arith.constant dense<0.000000e+00> : vector<16x256xf32>
    %149 = tpu.matmul %14, %148, %cst_56 {dimension_numbers = #tpu.dot_dimension_numbers<[1], [0], [0], [1], [0, 0, 1, 1], [], []>} : vector<16x4xf32>, vector<4x256xf32>, vector<16x256xf32> -> vector<16x256xf32>
    %150 = vector.broadcast %15 : vector<16x1xf32> to vector<16x256xf32>
    %151 = arith.addf %149, %150 : vector<16x256xf32>
    %cst_57 = arith.constant dense<0.000000e+00> : vector<16xf32>
    %152 = vector.multi_reduction <add>, %151, %cst_57 [1] : vector<16x256xf32> to vector<16xf32>
    %153 = vector.shape_cast %152 : vector<16xf32> to vector<16x1xf32>
    %cst_58 = arith.constant 2.560000e+02 : f32
    %154 = vector.broadcast %cst_58 : f32 to vector<16x1xf32>
    %155 = arith.divf %153, %154 : vector<16x1xf32>
    %cst_59 = arith.constant dense<0.000000e+00> : vector<2x1xf32>
    %156 = tpu.matmul %16, %155, %cst_59 {dimension_numbers = #tpu.dot_dimension_numbers<[1], [0], [0], [1], [0, 0, 1, 1], [], []>} : vector<2x16xf32>, vector<16x1xf32>, vector<2x1xf32> -> vector<2x1xf32>
    %157 = arith.addf %156, %17 : vector<2x1xf32>
    %cst_60 = arith.constant 0.000000e+00 : f32
    %158 = vector.broadcast %cst_60 : f32 to vector<2x1xf32>
    %159 = arith.maximumf %157, %158 : vector<2x1xf32>
    %cst_61 = arith.constant dense<0.000000e+00> : vector<16x1xf32>
    %160 = tpu.matmul %18, %159, %cst_61 {dimension_numbers = #tpu.dot_dimension_numbers<[1], [0], [0], [1], [0, 0, 1, 1], [], []>} : vector<16x2xf32>, vector<2x1xf32>, vector<16x1xf32> -> vector<16x1xf32>
    %161 = arith.addf %160, %19 : vector<16x1xf32>
    %cst_62 = arith.constant 0.000000e+00 : f32
    %162 = vector.broadcast %cst_62 : f32 to vector<16x1xf32>
    %163 = arith.subf %162, %161 : vector<16x1xf32>
    %164 = math.exp %163 : vector<16x1xf32>
    %cst_63 = arith.constant 1.000000e+00 : f32
    %165 = vector.broadcast %cst_63 : f32 to vector<16x1xf32>
    %166 = arith.addf %165, %164 : vector<16x1xf32>
    %167 = tpu.reciprocal %166 : vector<16x1xf32> -> vector<16x1xf32>
    %168 = vector.broadcast %167 : vector<16x1xf32> to vector<16x256xf32>
    %169 = arith.mulf %151, %168 : vector<16x256xf32>
    %170 = arith.addf %169, %21 : vector<16x256xf32>
    %cst_64 = arith.constant 0.000000e+00 : f32
    %171 = vector.broadcast %cst_64 : f32 to vector<16x256xf32>
    %172 = arith.maximumf %170, %171 : vector<16x256xf32>
    %c0_65 = arith.constant 0 : index
    %c0_66 = arith.constant 0 : index
    %c0_67 = arith.constant 0 : index
    %173 = vector.load %arg14[%c0_65, %c0_66, %c0_67] : memref<1x16x256xf32, #tpu.memory_space<vmem>>, vector<1x16x256xf32>
    %174 = vector.shape_cast %173 : vector<1x16x256xf32> to vector<16x256xf32>
    %175 = vector.shape_cast %172 : vector<16x256xf32> to vector<1x16x256xf32>
    tpu.vector_store %arg14[%c0_65, %c0_66, %c0_67], %175 {strides = array<i32>} : memref<1x16x256xf32, #tpu.memory_space<vmem>>, vector<1x16x256xf32>,
    return
  }
  func.func @transform_0(%arg0: i32) -> (i32, i32, i32) {
    %c0_i32 = arith.constant 0 : i32
    %c0_i32_0 = arith.constant 0 : i32
    %c0_i32_1 = arith.constant 0 : i32
    return %arg0, %c0_i32, %c0_i32_0 : i32, i32, i32
  }
  func.func @transform_1(%arg0: i32) -> (i32, i32) {
    %c0_i32 = arith.constant 0 : i32
    %c0_i32_0 = arith.constant 0 : i32
    %c0_i32_1 = arith.constant 0 : i32
    return %c0_i32, %c0_i32_0 : i32, i32
  }
  func.func @transform_2(%arg0: i32) -> (i32, i32) {
    %c0_i32 = arith.constant 0 : i32
    %c0_i32_0 = arith.constant 0 : i32
    %c0_i32_1 = arith.constant 0 : i32
    return %c0_i32, %c0_i32_0 : i32, i32
  }
  func.func @transform_3(%arg0: i32) -> (i32, i32) {
    %c0_i32 = arith.constant 0 : i32
    %c0_i32_0 = arith.constant 0 : i32
    %c0_i32_1 = arith.constant 0 : i32
    return %c0_i32, %c0_i32_0 : i32, i32
  }
  func.func @transform_4(%arg0: i32) -> (i32, i32, i32) {
    %c0_i32 = arith.constant 0 : i32
    %c0_i32_0 = arith.constant 0 : i32
    %c0_i32_1 = arith.constant 0 : i32
    %c0_i32_2 = arith.constant 0 : i32
    return %c0_i32, %c0_i32_0, %c0_i32_1 : i32, i32, i32
  }
  func.func @transform_5(%arg0: i32) -> (i32, i32, i32) {
    %c0_i32 = arith.constant 0 : i32
    %c0_i32_0 = arith.constant 0 : i32
    %c0_i32_1 = arith.constant 0 : i32
    %c0_i32_2 = arith.constant 0 : i32
    return %c0_i32, %c0_i32_0, %c0_i32_1 : i32, i32, i32
  }
  func.func @transform_6(%arg0: i32) -> (i32, i32) {
    %c0_i32 = arith.constant 0 : i32
    %c0_i32_0 = arith.constant 0 : i32
    %c0_i32_1 = arith.constant 0 : i32
    return %c0_i32, %c0_i32_0 : i32, i32
  }
  func.func @transform_7(%arg0: i32) -> (i32, i32) {
    %c0_i32 = arith.constant 0 : i32
    %c0_i32_0 = arith.constant 0 : i32
    %c0_i32_1 = arith.constant 0 : i32
    return %c0_i32, %c0_i32_0 : i32, i32
  }
  func.func @transform_8(%arg0: i32) -> (i32, i32) {
    %c0_i32 = arith.constant 0 : i32
    %c0_i32_0 = arith.constant 0 : i32
    %c0_i32_1 = arith.constant 0 : i32
    return %c0_i32, %c0_i32_0 : i32, i32
  }
  func.func @transform_9(%arg0: i32) -> (i32, i32) {
    %c0_i32 = arith.constant 0 : i32
    %c0_i32_0 = arith.constant 0 : i32
    %c0_i32_1 = arith.constant 0 : i32
    return %c0_i32, %c0_i32_0 : i32, i32
  }
  func.func @transform_10(%arg0: i32) -> (i32, i32) {
    %c0_i32 = arith.constant 0 : i32
    %c0_i32_0 = arith.constant 0 : i32
    %c0_i32_1 = arith.constant 0 : i32
    return %c0_i32, %c0_i32_0 : i32, i32
  }
  func.func @transform_11(%arg0: i32) -> (i32, i32) {
    %c0_i32 = arith.constant 0 : i32
    %c0_i32_0 = arith.constant 0 : i32
    %c0_i32_1 = arith.constant 0 : i32
    return %c0_i32, %c0_i32_0 : i32, i32
  }
  func.func @transform_12(%arg0: i32) -> (i32, i32) {
    %c0_i32 = arith.constant 0 : i32
    %c0_i32_0 = arith.constant 0 : i32
    %c0_i32_1 = arith.constant 0 : i32
    return %c0_i32, %c0_i32_0 : i32, i32
  }
  func.func @transform_13(%arg0: i32) -> (i32, i32, i32) {
    %c0_i32 = arith.constant 0 : i32
    %c0_i32_0 = arith.constant 0 : i32
    %c0_i32_1 = arith.constant 0 : i32
    return %arg0, %c0_i32, %c0_i32_0 : i32, i32, i32
  }
}

</mosaic_0001>

<bundles_post_ra>
// kernel: res_block_forward.1
= control target key start
LH: loop header
LB: loop body
LE: loop exit
PB: predicated region body
PF: predicated region fallthrough
CT: control target
= control target key end

     0   :  { %s2082_s25 = smov 0   ;;  %s2534_s0 = inlined_call_operand.vmem [shape: f32[2,16,256], index: 0, kind: input, shape index: {}]   ;;  %s2535_s1 = inlined_call_operand.vmem [shape: f32[9,256], index: 1, kind: input, shape index: {}]   ;;  %s2536_s2 = inlined_call_operand.vmem [shape: f32[4,16], index: 2, kind: input, shape index: {}]   ;;  %s2537_s3 = inlined_call_operand.vmem [shape: f32[4,1], index: 3, kind: input, shape index: {}]   ;;  %s2538_s4 = inlined_call_operand.vmem [shape: f32[9,4,4], index: 4, kind: input, shape index: {}]   ;;  %s2539_s5 = inlined_call_operand.vmem [shape: f32[9,4,4], index: 5, kind: input, shape index: {}]   ;;  %s2540_s6 = inlined_call_operand.vmem [shape: f32[4,1], index: 6, kind: input, shape index: {}]   ;;  %s2541_s7 = inlined_call_operand.vmem [shape: f32[16,4], index: 7, kind: input, shape index: {}]   ;;  %s2542_s8 = inlined_call_operand.vmem [shape: f32[16,1], index: 8, kind: input, shape index: {}]   ;;  %s2543_s9 = inlined_call_operand.vmem [shape: f32[2,16], index: 9, kind: input, shape index: {}]   ;;  %s2544_s10 = inlined_call_operand.vmem [shape: f32[2,1], index: 10, kind: input, shape index: {}]   ;;  %s2545_s11 = inlined_call_operand.vmem [shape: f32[16,2], index: 11, kind: input, shape index: {}]   ;;  %s2546_s12 = inlined_call_operand.vmem [shape: f32[16,1], index: 12, kind: input, shape index: {}]   ;;  %s2547_s13 = inlined_call_operand.vmem [shape: f32[2,16,256], index: 13, kind: output, shape index: {}]  }
   0x1 LB: > { %s1864_s26 = sadd.s32 4294967295, %s2000_s25   ;;  %p1868_p0 = scmp.ge.s32.totalorder %s2000_s25, 1  ;;  %s2000_s25 = sphi %s2082_s25, %s23_s25  }
   0x2   : > { %p387_p1 = scmp.lt.s32.totalorder %s2000_s25, 3 }
   0x4   : > { %p388_p2 = pnand %p1868_p0, %p387_p1 }
   0x5   : > { %p431_p3 = scmp.lt.s32.totalorder (!%p388_p2), %s1864_s26, 1  ;;  %s2003_s18 = smov (!%p388_p2), 17  }
   0x6   : > { %391 = sbr.rel (%p388_p2) target bundleno = 1395 (0x573), region = 72  ;;  %s2004_s19 = smov (!%p388_p2), 16  }
   0x7   : > { %s2005_s20 = smov (!%p388_p2), 15   ;;  %s2006_s21 = smov (!%p388_p2), 1  }
   0x8   : > { %s2007_s22 = smov (!%p388_p2), 127   ;;  %s2008_s23 = smov (!%p388_p2), 113  }
   0x9   : > { %s2009_s24 = smov (!%p388_p2), 112   ;;  %s2010_s27 = smov (!%p388_p2), 111  }
   0xb   : > { %v2002_v0 = vmov 0   ;;  %v446_v1 = vld [vmem:[%s2537_s3] sm:$0xf]  ;;  %s2549_s26 = smov (!%p431_p3, %s1864_s26), 1  ;;  %vm485_vm0 = vcmask 130048   ;;  %v535_v14 = vlaneseq  ;;  %v2164_v18 = vld [vmem:[%s2535_s1 + $0x8] sm:$0xff] }
   0xc   : > { %1979 = vset.pattern.permute.xlu0 %v2002_v0  ;;  %1980 = vset.pattern.permute.xlu1 %v2002_v0  ;;  %s1959_s29 = sshll.u32 %s2549_s26, 5  ;;  %v445_v6 = vld [vmem:[%s2536_s2] sm:$0xf]  ;;  %v552_v20 = vperm.slane %v2164_v18, 1  ;;  %vm559_vm2 = vcmask 1043456   ;;  %vm555_vm3 = vcmask 31744  }
   0xd   : > { %482 = vperm.xlu0 %1979, %v446_v1   ;;  %1981 = vset.pattern.permute.xlu2 %v2002_v0  ;;  %s435_s15 = scalar_lea.vmem %s2534_s0, %s1959_s29  ;;  %v2154_v16 = vand.u32 127, %v535_v14  ;;  %v2159_v17 = vld [vmem:[%s2535_s1] sm:$0xff]  ;;  %v541_v30 = vperm.slane %v2164_v18, 0  ;;  %v663_v32 = vperm.slane %v2164_v18, 2  ;;  %v449_v45 = vld [vmem:[%s2538_s4 + $0x8] sm:$0xf] }
   0xe   : > { %v2101_v2 = vld [vmem:[%s435_s15 + $0x10] sm:$0xff]  ;;  %v2103_v3 = vld [vmem:[%s435_s15 + $0x18] sm:$0xff]  ;;  %v2105_v4 = vld [vmem:[%s435_s15] sm:$0xff]  ;;  %v551_v19 = vperm.slane %v2159_v17, 1  ;;  %v540_v29 = vperm.slane %v2159_v17, 0  ;;  %v662_v31 = vperm.slane %v2159_v17, 2 }
   0xf   : > { %503 = vmatpush.msra.mxu0 %v2101_v2  ;;  %523 = vmatpush.msra.mxu1 %v2103_v3  ;;  %v2109_v5 = vld [vmem:[%s435_s15 + $0x8] sm:$0xff]  ;;  %vm548_vm1 = vcmp.lt.s32.totalorder %v2154_v16, 16  ;;  %v448_v28 = vld [vmem:[%s2538_s4 + $0x4] sm:$0xf]  ;;  %vm537_vm4 = vcmp.lt.s32.totalorder %v2154_v16, 17  ;;  %vm659_vm5 = vcmp.lt.s32.totalorder %v2154_v16, 15 }
  0x10   : > { %v447_v43 = vld [vmem:[%s2538_s4] sm:$0xf]  ;;  %vm721_vm6 = vcmp.lt.s32.totalorder %v2154_v16, 1  ;;  %v724_v46 = vperm.slane %v2159_v17, 3  ;;  %v725_v47 = vperm.slane %v2164_v18, 3  ;;  %vm834_vm7 = vcmp.lt.s32.totalorder %v2154_v16, 127 }
  0x11   : > { %504 = vmatpush.msra.mxu0 %v2105_v4  ;;  %524 = vmatpush.msra.mxu1 %v2109_v5  ;;  %v450_v54 = vld [vmem:[%s2538_s4 + $0xc] sm:$0xf]  ;;  %v451_v55 = vld [vmem:[%s2538_s4 + $0x10] sm:$0xf]  ;;  %v837_v57 = vperm.slane %v2159_v17, 5  ;;  %v838_v58 = vperm.slane %v2164_v18, 5 }
  0x12   : > { %1873 = vmatmul.msk.f32.vlgmr.msra.gmra.mxu0 %vm485_vm0, %v445_v6  ;;  %1874 = vmatmul.msk.f32.vlgmr.msra.gmra.mxu1 %vm485_vm0, %v445_v6  ;;  %vm896_vm8 = vcmp.lt.s32.totalorder %v2154_v16, 113  ;;  %v899_v59 = vperm.slane %v2159_v17, 6  ;;  %v900_v60 = vperm.slane %v2164_v18, 6  ;;  %vm958_vm9 = vcmp.lt.s32.totalorder %v2154_v16, 112 }
  0x13   : > { %v962_v14 = vperm.slane %v2164_v18, 7  ;;  %vm1020_vm10 = vcmp.lt.s32.totalorder %v2154_v16, 111  ;;  %v464_v16 = vld [vmem:[%s2539_s5 + $0x20] sm:$0xf]  ;;  %vm1720_vm12 = vcmask 1041408   ;;  %vm1713_vm13 = vcmask 15360  }
  0x7f   : > { %v483_v7 = vpop.permute.xlu0 %482 }
  0x8f   : > { %v506_v8 = vpop.f32.mrf.mxu0  ;;  %v526_v9 = vpop.f32.mrf.mxu1 }
  0x90   : > { %v507_v10 = vadd.f32 %v506_v8, %v483_v7  ;;  %v527_v11 = vadd.f32 %v526_v9, %v483_v7 }
  0x92   : > { %v2118_v12 = vmax.f32 %v507_v10, 0.0  ;;  %v2120_v13 = vmax.f32 %v527_v11, 0.0  ;;  %v452_v11 = vld [vmem:[%s2538_s4 + $0x14] sm:$0xf] }
  0x94   : > { %533 = vrot.lane.b32.xlu2 %v2120_v13, %s2003_s18  ;;  %546 = vrot.lane.b32.xlu1 %v2120_v13, %s2004_s19 }
  0x95   : > { %544 = vrot.lane.b32.xlu0 %v2118_v12, %s2004_s19 }
  0x9c   : > { %655 = vrot.lane.b32.xlu2 %v2118_v12, %s2005_s20  ;;  %531 = vrot.lane.b32.xlu1 %v2118_v12, %s2003_s18 }
  0x9d   : > { %657 = vrot.lane.b32.xlu0 %v2120_v13, %s2005_s20 }
  0xa4   : > { %719 = vrot.lane.b32.xlu2 %v2120_v13, %s2006_s21  ;;  %717 = vrot.lane.b32.xlu1 %v2118_v12, %s2006_s21 }
  0xa5   : > { %830 = vrot.lane.b32.xlu0 %v2118_v12, %s2007_s22 }
  0xac   : > { %892 = vrot.lane.b32.xlu2 %v2118_v12, %s2008_s23  ;;  %832 = vrot.lane.b32.xlu1 %v2120_v13, %s2007_s22 }
  0xad   : > { %894 = vrot.lane.b32.xlu0 %v2120_v13, %s2008_s23 }
  0xb4   : > { %956 = vrot.lane.b32.xlu2 %v2120_v13, %s2009_s24  ;;  %954 = vrot.lane.b32.xlu1 %v2118_v12, %s2009_s24 }
  0xb5   : > { %1016 = vrot.lane.b32.xlu0 %v2118_v12, %s2010_s27 }
  0xbc   : > { %1018 = vrot.lane.b32.xlu1 %v2120_v13, %s2010_s27 }
  0xee   : > { %v534_v15 = vpop.permute.xlu2 %533 }
  0xf6   : > { %v656_v23 = vpop.permute.xlu2 %655 }
  0xfe   : > { %v720_v44 = vpop.permute.xlu2 %719 }
 0x106   : > { %v547_v21 = vpop.permute.xlu1 %546  ;;  %v893_v56 = vpop.permute.xlu2 %892 }
 0x107   : > { %v545_v22 = vpop.permute.xlu0 %544 }
 0x108   : > { %v549_v24 = vsel %vm548_vm1, %v545_v22, %v547_v21  ;;  %v550_v25 = vsel %vm548_vm1, %v547_v21, %v545_v22 }
 0x109   : > { %v553_v26 = vmul.f32 %v551_v19, %v550_v25  ;;  %v554_v27 = vmul.f32 %v552_v20, %v549_v24 }
 0x10b   : > { %1875 = vmatpush.msk.msra.mxu2 %vm559_vm2, %v553_v26  ;;  %1877 = vmatpush.msk.msra.mxu3 %vm559_vm2, %v554_v27  ;;  %v454_v26 = vld [vmem:[%s2538_s4 + $0x1c] sm:$0xf]  ;;  %v2305_v27 = vld [vmem:[%s2535_s1 + $0x10] ss:$0 sm:$0xff] }
 0x10c   : > { %1876 = vmatmul.msk.f32.vlgmr.msra.gmra.mxu2 %vm555_vm3, %v448_v28  ;;  %1878 = vmatmul.msk.f32.vlgmr.msra.gmra.mxu3 %vm555_vm3, %v448_v28  ;;  %v2310_v28 = vld [vmem:[%s2535_s1 + $0x18] ss:$0 sm:$0xff] }
 0x10e   : > { %v532_v33 = vpop.permute.xlu1 %531 }
 0x10f   : > { %v538_v34 = vsel %vm537_vm4, %v532_v33, %v534_v15  ;;  %v539_v35 = vsel %vm537_vm4, %v534_v15, %v532_v33  ;;  %v658_v36 = vpop.permute.xlu0 %657  ;;  %v957_v15 = vpop.permute.xlu2 %956 }
 0x110   : > { %v542_v37 = vmul.f32 %v540_v29, %v539_v35  ;;  %v543_v38 = vmul.f32 %v541_v30, %v538_v34  ;;  %v660_v39 = vsel %vm659_vm5, %v656_v23, %v658_v36  ;;  %v661_v40 = vsel %vm659_vm5, %v658_v36, %v656_v23 }
 0x111   : > { %v664_v41 = vmul.f32 %v662_v31, %v661_v40  ;;  %v665_v42 = vmul.f32 %v663_v32, %v660_v39  ;;  %v455_v39 = vld [vmem:[%s2538_s4 + $0x20] sm:$0xf] }
 0x112   : > { %1879 = vmatpush.msk.msrb.mxu2 %vm559_vm2, %v542_v37  ;;  %1881 = vmatpush.msk.msrb.mxu3 %vm559_vm2, %v543_v38 }
 0x113   : > { %1883 = vmatpush.msk.msrb.mxu0 %vm559_vm2, %v664_v41  ;;  %1885 = vmatpush.msk.msrb.mxu1 %vm559_vm2, %v665_v42 }
 0x114   : > { %1880 = vmatmul.msk.f32.vlgmr.msrb.gmra.mxu2 %vm555_vm3, %v447_v43  ;;  %1882 = vmatmul.msk.f32.vlgmr.msrb.gmra.mxu3 %vm555_vm3, %v447_v43 }
 0x115   : > { %1891 = vmatpush.msk.msra.mxu0 %vm559_vm2, %v2118_v12  ;;  %1893 = vmatpush.msk.msra.mxu1 %vm559_vm2, %v2120_v13  ;;  %v453_v12 = vld [vmem:[%s2538_s4 + $0x18] sm:$0xf]  ;;  %v961_v13 = vperm.slane %v2159_v17, 7 }
 0x116   : > { %v718_v48 = vpop.permute.xlu1 %717  ;;  %1884 = vmatmul.msk.f32.vlgmr.msrb.gmra.mxu0 %vm555_vm3, %v449_v45  ;;  %1886 = vmatmul.msk.f32.vlgmr.msrb.gmra.mxu1 %vm555_vm3, %v449_v45 }
 0x117   : > { %v722_v49 = vsel %vm721_vm6, %v718_v48, %v720_v44  ;;  %v723_v50 = vsel %vm721_vm6, %v720_v44, %v718_v48  ;;  %v831_v51 = vpop.permute.xlu0 %830 }
 0x118   : > { %v726_v52 = vmul.f32 %v724_v46, %v723_v50  ;;  %v727_v53 = vmul.f32 %v725_v47, %v722_v49 }
 0x11a   : > { %1887 = vmatpush.msk.msra.mxu2 %vm559_vm2, %v726_v52  ;;  %1889 = vmatpush.msk.msra.mxu3 %vm559_vm2, %v727_v53 }
 0x11c   : > { %1888 = vmatmul.msk.f32.vlgmr.msra.gmra.mxu2 %vm555_vm3, %v450_v54  ;;  %1890 = vmatmul.msk.f32.vlgmr.msra.gmra.mxu3 %vm555_vm3, %v450_v54 }
 0x11e   : > { %v833_v61 = vpop.permute.xlu1 %832  ;;  %1892 = vmatmul.msk.f32.vlgmr.msra.gmra.mxu0 %vm555_vm3, %v451_v55  ;;  %1894 = vmatmul.msk.f32.vlgmr.msra.gmra.mxu1 %vm555_vm3, %v451_v55 }
 0x11f   : > { %v835_v62 = vsel %vm834_vm7, %v831_v51, %v833_v61  ;;  %v836_v63 = vsel %vm834_vm7, %v833_v61, %v831_v51  ;;  %v895_v0 = vpop.permute.xlu0 %894 }
 0x120   : > { %v839_v1 = vmul.f32 %v837_v57, %v835_v62  ;;  %v840_v6 = vmul.f32 %v838_v58, %v836_v63  ;;  %v897_v7 = vsel %vm896_vm8, %v893_v56, %v895_v0  ;;  %v898_v8 = vsel %vm896_vm8, %v895_v0, %v893_v56 }
 0x121   : > { %v901_v9 = vmul.f32 %v899_v59, %v897_v7  ;;  %v902_v10 = vmul.f32 %v900_v60, %v898_v8 }
 0x122   : > { %1895 = vmatpush.msk.msrb.mxu2 %vm559_vm2, %v839_v1  ;;  %1897 = vmatpush.msk.msrb.mxu3 %vm559_vm2, %v840_v6 }
 0x123   : > { %1899 = vmatpush.msk.msrb.mxu0 %vm559_vm2, %v901_v9  ;;  %1901 = vmatpush.msk.msrb.mxu1 %vm559_vm2, %v902_v10 }
 0x124   : > { %1896 = vmatmul.msk.f32.vlgmr.msrb.gmra.mxu2 %vm555_vm3, %v452_v11  ;;  %1898 = vmatmul.msk.f32.vlgmr.msrb.gmra.mxu3 %vm555_vm3, %v452_v11 }
 0x126   : > { %v955_v21 = vpop.permute.xlu1 %954  ;;  %1900 = vmatmul.msk.f32.vlgmr.msrb.gmra.mxu0 %vm555_vm3, %v453_v12  ;;  %1902 = vmatmul.msk.f32.vlgmr.msrb.gmra.mxu1 %vm555_vm3, %v453_v12 }
 0x127   : > { %v959_v22 = vsel %vm958_vm9, %v955_v21, %v957_v15  ;;  %v960_v23 = vsel %vm958_vm9, %v957_v15, %v955_v21  ;;  %v1017_v33 = vpop.permute.xlu0 %1016 }
 0x128   : > { %v963_v24 = vmul.f32 %v961_v13, %v959_v22  ;;  %v964_v25 = vmul.f32 %v962_v14, %v960_v23 }
 0x12a   : > { %1903 = vmatpush.msk.msra.mxu2 %vm559_vm2, %v963_v24  ;;  %1905 = vmatpush.msk.msra.mxu3 %vm559_vm2, %v964_v25 }
 0x12c   : > { %1904 = vmatmul.msk.f32.vlgmr.msra.gmra.mxu2 %vm555_vm3, %v454_v26  ;;  %1906 = vmatmul.msk.f32.vlgmr.msra.gmra.mxu3 %vm555_vm3, %v454_v26 }
 0x12e   : > { %v1019_v34 = vpop.permute.xlu1 %1018 }
 0x12f   : > { %v1021_v35 = vsel %vm1020_vm10, %v1017_v33, %v1019_v34  ;;  %v1022_v36 = vsel %vm1020_vm10, %v1019_v34, %v1017_v33  ;;  %v465_v33 = vld [vmem:[%s2540_s6] sm:$0xf] }
 0x130   : > { %v1025_v37 = vmul.f32 %v2305_v27, %v1021_v35  ;;  %v1026_v38 = vmul.f32 %v2310_v28, %v1022_v36 }
 0x132   : > { %1907 = vmatpush.msk.msra.mxu0 %vm559_vm2, %v1025_v37  ;;  %1909 = vmatpush.msk.msra.mxu1 %vm559_vm2, %v1026_v38 }
 0x133   : > { %1908 = vmatmul.msk.f32.vlgmr.msra.gmra.mxu0 %vm555_vm3, %v455_v39  ;;  %1910 = vmatmul.msk.f32.vlgmr.msra.gmra.mxu1 %vm555_vm3, %v455_v39 }
 0x18f   : > { %v583_v40 = vpop.f32.mrf.mxu2  ;;  %v603_v41 = vpop.f32.mrf.mxu3 }
 0x193   : > { %v692_v42 = vpop.f32.mrf.mxu0  ;;  %v712_v43 = vpop.f32.mrf.mxu1 }
 0x197   : > { %v632_v44 = vpop.f32.mrf.mxu2  ;;  %v652_v45 = vpop.f32.mrf.mxu3 }
 0x198   : > { %v633_v50 = vadd.f32 %v632_v44, %v583_v40  ;;  %v653_v51 = vadd.f32 %v652_v45, %v603_v41 }
 0x19a   : > { %v715_v54 = vadd.f32 %v692_v42, %v633_v50  ;;  %v716_v55 = vadd.f32 %v712_v43, %v653_v51 }
 0x19b   : > { %v805_v48 = vpop.f32.mrf.mxu0  ;;  %v825_v49 = vpop.f32.mrf.mxu1 }
 0x19f   : > { %v754_v52 = vpop.f32.mrf.mxu2  ;;  %v774_v53 = vpop.f32.mrf.mxu3 }
 0x1a0   : > { %v777_v56 = vadd.f32 %v754_v52, %v715_v54  ;;  %v778_v61 = vadd.f32 %v774_v53, %v716_v55  ;;  %v456_v52 = vld [vmem:[%s2539_s5] sm:$0xf]  ;;  %v458_v54 = vld [vmem:[%s2539_s5 + $0x8] sm:$0xf] }
 0x1a2   : > { %v828_v6 = vadd.f32 %v805_v48, %v777_v56  ;;  %v829_v7 = vadd.f32 %v825_v49, %v778_v61  ;;  %v457_v49 = vld [vmem:[%s2539_s5 + $0x4] sm:$0xf] }
 0x1a3   : > { %v929_v62 = vpop.f32.mrf.mxu0  ;;  %v949_v63 = vpop.f32.mrf.mxu1 }
 0x1a7   : > { %v867_v0 = vpop.f32.mrf.mxu2  ;;  %v887_v1 = vpop.f32.mrf.mxu3 }
 0x1a8   : > { %v890_v8 = vadd.f32 %v867_v0, %v828_v6  ;;  %v891_v9 = vadd.f32 %v887_v1, %v829_v7  ;;  %v459_v7 = vld [vmem:[%s2539_s5 + $0xc] sm:$0xf] }
 0x1aa   : > { %v952_v10 = vadd.f32 %v929_v62, %v890_v8  ;;  %v953_v11 = vadd.f32 %v949_v63, %v891_v9 }
 0x1af   : > { %v991_v12 = vpop.f32.mrf.mxu2  ;;  %v1011_v15 = vpop.f32.mrf.mxu3 }
 0x1b0   : > { %v1014_v21 = vadd.f32 %v991_v12, %v952_v10  ;;  %v1015_v22 = vadd.f32 %v1011_v15, %v953_v11  ;;  %v1053_v23 = vpop.f32.mrf.mxu0  ;;  %v1073_v24 = vpop.f32.mrf.mxu1  ;;  %v461_v12 = vld [vmem:[%s2539_s5 + $0x14] sm:$0xf]  ;;  %v462_v15 = vld [vmem:[%s2539_s5 + $0x18] sm:$0xf] }
 0x1b2   : > { %v1076_v25 = vadd.f32 %v1053_v23, %v1014_v21  ;;  %v1077_v26 = vadd.f32 %v1073_v24, %v1015_v22 }
 0x1b4   : > { %1088 = vrot.lane.b32.xlu0 %v1077_v26, %s2004_s19  ;;  %1192 = vrot.lane.b32.xlu1 %v1076_v25, %s2005_s20 }
 0x1b5   : > { %1086 = vrot.lane.b32.xlu2 %v1076_v25, %s2004_s19 }
 0x1bc   : > { %1078 = vrot.lane.b32.xlu0 %v1076_v25, %s2003_s18  ;;  %1080 = vrot.lane.b32.xlu1 %v1077_v26, %s2003_s18  ;;  %s440_s18 = scalar_lea.vmem %s2547_s13, %s1959_s29 }
 0x1bd   : > { %1194 = vrot.lane.b32.xlu2 %v1077_v26, %s2005_s20 }
 0x1c4   : > { %1253 = vrot.lane.b32.xlu0 %v1077_v26, %s2006_s21  ;;  %1420 = vrot.lane.b32.xlu1 %v1076_v25, %s2008_s23 }
 0x1c5   : > { %1251 = vrot.lane.b32.xlu2 %v1076_v25, %s2006_s21 }
 0x1cc   : > { %1361 = vrot.lane.b32.xlu0 %v1076_v25, %s2007_s22  ;;  %1363 = vrot.lane.b32.xlu1 %v1077_v26, %s2007_s22 }
 0x1cd   : > { %1422 = vrot.lane.b32.xlu2 %v1077_v26, %s2008_s23 }
 0x1d4   : > { %1540 = vrot.lane.b32.xlu0 %v1077_v26, %s2010_s27  ;;  %1479 = vrot.lane.b32.xlu1 %v1076_v25, %s2009_s24 }
 0x1d5   : > { %1538 = vrot.lane.b32.xlu2 %v1076_v25, %s2010_s27 }
 0x1dc   : > { %1599 = vperm.xlu0 %1979, %v465_v33  }
 0x1dd   : > { %1481 = vrot.lane.b32.xlu2 %v1077_v26, %s2009_s24 }
 0x20f   : > { %v1087_v34 = vpop.permute.xlu2 %1086 }
 0x217   : > { %v1195_v35 = vpop.permute.xlu2 %1194 }
 0x21f   : > { %v1252_v38 = vpop.permute.xlu2 %1251 }
 0x226   : > { %v1089_v36 = vpop.permute.xlu0 %1088  ;;  %v1193_v37 = vpop.permute.xlu1 %1192 }
 0x227   : > { %v1090_v39 = vsel %vm548_vm1, %v1087_v34, %v1089_v36  ;;  %v1091_v40 = vsel %vm548_vm1, %v1089_v36, %v1087_v34  ;;  %v1196_v41 = vsel %vm659_vm5, %v1193_v37, %v1195_v35  ;;  %v1197_v42 = vsel %vm659_vm5, %v1195_v35, %v1193_v37  ;;  %v1423_v53 = vpop.permute.xlu2 %1422  ;;  %v463_v36 = vld [vmem:[%s2539_s5 + $0x1c] sm:$0xf] }
 0x228   : > { %v1092_v43 = vmul.f32 %v1091_v40, %v551_v19  ;;  %v1093_v44 = vmul.f32 %v1090_v39, %v552_v20  ;;  %v1198_v45 = vmul.f32 %v1197_v42, %v662_v31  ;;  %v1199_v48 = vmul.f32 %v1196_v41, %v663_v32 }
 0x22a   : > { %1911 = vmatpush.msk.msrb.mxu2 %vm559_vm2, %v1092_v43  ;;  %1913 = vmatpush.msk.msrb.mxu3 %vm559_vm2, %v1093_v44 }
 0x22b   : > { %1912 = vmatmul.msk.f32.vlgmr.msrb.gmra.mxu2 %vm555_vm3, %v457_v49  ;;  %1914 = vmatmul.msk.f32.vlgmr.msrb.gmra.mxu3 %vm555_vm3, %v457_v49 }
 0x22c   : > { %1919 = vmatpush.msk.msra.mxu2 %vm559_vm2, %v1198_v45  ;;  %1921 = vmatpush.msk.msra.mxu3 %vm559_vm2, %v1199_v48  ;;  %v469_v45 = vld [vmem:[%s2542_s8 + $0x8] sm:$0xff]  ;;  %v468_v48 = vld [vmem:[%s2542_s8] sm:$0xff] }
 0x22d   : > { %1613 = vperm.xlu1 %1980, %v469_v45   ;;  %1608 = vperm.xlu2 %1981, %v468_v48  }
 0x22e   : > { %1927 = vmatpush.msk.msrb.mxu2 %vm559_vm2, %v1076_v25  ;;  %1929 = vmatpush.msk.msrb.mxu3 %vm559_vm2, %v1077_v26  ;;  %v1079_v19 = vpop.permute.xlu0 %1078  ;;  %v1081_v20 = vpop.permute.xlu1 %1080 }
 0x22f   : > { %v1082_v31 = vsel %vm537_vm4, %v1079_v19, %v1081_v20  ;;  %v1083_v32 = vsel %vm537_vm4, %v1081_v20, %v1079_v19  ;;  %v1539_v8 = vpop.permute.xlu2 %1538 }
 0x230   : > { %v1084_v50 = vmul.f32 %v1083_v32, %v540_v29  ;;  %v1085_v51 = vmul.f32 %v1082_v31, %v541_v30 }
 0x232   : > { %1915 = vmatpush.msk.msrb.mxu0 %vm559_vm2, %v1084_v50  ;;  %1917 = vmatpush.msk.msrb.mxu1 %vm559_vm2, %v1085_v51 }
 0x233   : > { %1916 = vmatmul.msk.f32.vlgmr.msrb.gmra.mxu0 %vm555_vm3, %v456_v52  ;;  %1918 = vmatmul.msk.f32.vlgmr.msrb.gmra.mxu1 %vm555_vm3, %v456_v52 }
 0x234   : > { %1920 = vmatmul.msk.f32.vlgmr.msra.gmra.mxu2 %vm555_vm3, %v458_v54  ;;  %1922 = vmatmul.msk.f32.vlgmr.msra.gmra.mxu3 %vm555_vm3, %v458_v54 }
 0x236   : > { %v1254_v29 = vpop.permute.xlu0 %1253  ;;  %v1421_v30 = vpop.permute.xlu1 %1420 }
 0x237   : > { %v1255_v55 = vsel %vm721_vm6, %v1252_v38, %v1254_v29  ;;  %v1256_v56 = vsel %vm721_vm6, %v1254_v29, %v1252_v38  ;;  %v1424_v61 = vsel %vm896_vm8, %v1421_v30, %v1423_v53  ;;  %v1425_v62 = vsel %vm896_vm8, %v1423_v53, %v1421_v30 }
 0x238   : > { %v1257_v63 = vmul.f32 %v1256_v56, %v724_v46  ;;  %v1258_v0 = vmul.f32 %v1255_v55, %v725_v47  ;;  %v1426_v1 = vmul.f32 %v1424_v61, %v899_v59  ;;  %v1427_v6 = vmul.f32 %v1425_v62, %v900_v60  ;;  %v460_v46 = vld [vmem:[%s2539_s5 + $0x10] sm:$0xf] }
 0x23a   : > { %1923 = vmatpush.msk.msra.mxu0 %vm559_vm2, %v1257_v63  ;;  %1925 = vmatpush.msk.msra.mxu1 %vm559_vm2, %v1258_v0 }
 0x23b   : > { %1935 = vmatpush.msk.msra.mxu2 %vm559_vm2, %v1426_v1  ;;  %1937 = vmatpush.msk.msra.mxu3 %vm559_vm2, %v1427_v6 }
 0x23c   : > { %1924 = vmatmul.msk.f32.vlgmr.msra.gmra.mxu0 %vm555_vm3, %v459_v7  ;;  %1926 = vmatmul.msk.f32.vlgmr.msra.gmra.mxu1 %vm555_vm3, %v459_v7 }
 0x23d   : > { %1928 = vmatmul.msk.f32.vlgmr.msrb.gmra.mxu2 %vm555_vm3, %v460_v46  ;;  %1930 = vmatmul.msk.f32.vlgmr.msrb.gmra.mxu3 %vm555_vm3, %v460_v46 }
 0x23e   : > { %v1362_v47 = vpop.permute.xlu0 %1361  ;;  %v1364_v59 = vpop.permute.xlu1 %1363 }
 0x23f   : > { %v1365_v60 = vsel %vm834_vm7, %v1362_v47, %v1364_v59  ;;  %v1366_v9 = vsel %vm834_vm7, %v1364_v59, %v1362_v47 }
 0x240   : > { %v1367_v10 = vmul.f32 %v1365_v60, %v837_v57  ;;  %v1368_v11 = vmul.f32 %v1366_v9, %v838_v58  ;;  %v1482_v57 = vpop.permute.xlu2 %1481  ;;  %v466_v60 = vld [vmem:[%s2541_s7] sm:$0xff]  ;;  %v467_v9 = vld [vmem:[%s2541_s7 + $0x8] sm:$0xff] }
 0x242   : > { %1931 = vmatpush.msk.msrb.mxu0 %vm559_vm2, %v1367_v10  ;;  %1933 = vmatpush.msk.msrb.mxu1 %vm559_vm2, %v1368_v11 }
 0x244   : > { %1932 = vmatmul.msk.f32.vlgmr.msrb.gmra.mxu0 %vm555_vm3, %v461_v12  ;;  %1934 = vmatmul.msk.f32.vlgmr.msrb.gmra.mxu1 %vm555_vm3, %v461_v12 }
 0x245   : > { %1936 = vmatmul.msk.f32.vlgmr.msra.gmra.mxu2 %vm555_vm3, %v462_v15  ;;  %1938 = vmatmul.msk.f32.vlgmr.msra.gmra.mxu3 %vm555_vm3, %v462_v15 }
 0x246   : > { %v1541_v58 = vpop.permute.xlu0 %1540  ;;  %v1480_v21 = vpop.permute.xlu1 %1479 }
 0x247   : > { %v1542_v22 = vsel %vm1020_vm10, %v1539_v8, %v1541_v58  ;;  %v1543_v23 = vsel %vm1020_vm10, %v1541_v58, %v1539_v8  ;;  %v1483_v24 = vsel %vm958_vm9, %v1480_v21, %v1482_v57  ;;  %v1484_v25 = vsel %vm958_vm9, %v1482_v57, %v1480_v21 }
 0x248   : > { %v1544_v26 = vmul.f32 %v2305_v27, %v1542_v22  ;;  %v1545_v33 = vmul.f32 %v2310_v28, %v1543_v23  ;;  %v1485_v34 = vmul.f32 %v1483_v24, %v961_v13  ;;  %v1486_v35 = vmul.f32 %v1484_v25, %v962_v14 }
 0x24a   : > { %1939 = vmatpush.msk.msra.mxu0 %vm559_vm2, %v1485_v34  ;;  %1941 = vmatpush.msk.msra.mxu1 %vm559_vm2, %v1486_v35 }
 0x24b   : > { %1943 = vmatpush.msk.msrb.mxu2 %vm559_vm2, %v1544_v26  ;;  %1945 = vmatpush.msk.msrb.mxu3 %vm559_vm2, %v1545_v33  ;;  %v2011_v33 = vmov 256.0  }
 0x24c   : > { %1940 = vmatmul.msk.f32.vlgmr.msra.gmra.mxu0 %vm555_vm3, %v463_v36  ;;  %1942 = vmatmul.msk.f32.vlgmr.msra.gmra.mxu1 %vm555_vm3, %v463_v36  ;;  %1984 = vrcp.f32 %v2011_v33 }
 0x24d   : > { %1944 = vmatmul.msk.f32.vlgmr.msrb.gmra.mxu2 %vm555_vm3, %v464_v16  ;;  %1946 = vmatmul.msk.f32.vlgmr.msrb.gmra.mxu3 %vm555_vm3, %v464_v16 }
 0x24e   : > { %v1600_v7 = vpop.permute.xlu0 %1599 }
 0x252   : > { %v1985_v34 = vpop.eup %1984 }
 0x253   : > { %v1681_v35 = vmul.f32 256.0, %v1985_v34  ;;  %vm1685_vm11 = vweird.f32 %v1985_v34 }
 0x255   : > { %v1682_v36 = vsub.f32 1.0, %v1681_v35 }
 0x257   : > { %v1683_v16 = vmul.f32 %v1985_v34, %v1682_v36 }
 0x287   : > { %v1609_v10 = vpop.permute.xlu2 %1608 }
 0x29f   : > { %v1614_v21 = vpop.permute.xlu1 %1613 }
 0x2ae   : > { %v1120_v17 = vpop.f32.mrf.mxu2  ;;  %v1140_v18 = vpop.f32.mrf.mxu3 }
 0x2b0   : > { %v1169_v13 = vpop.f32.mrf.mxu0  ;;  %v1189_v14 = vpop.f32.mrf.mxu1 }
 0x2b1   : > { %v1170_v39 = vadd.f32 %v1169_v13, %v1120_v17  ;;  %v1190_v40 = vadd.f32 %v1189_v14, %v1140_v18  ;;  %v1684_v17 = vadd.f32 %v1985_v34, %v1683_v16 }
 0x2b3   : > { %v1686_v18 = vsel %vm1685_vm11, %v1985_v34, %v1684_v17 }
 0x2b7   : > { %v1226_v27 = vpop.f32.mrf.mxu2  ;;  %v1246_v28 = vpop.f32.mrf.mxu3 }
 0x2b8   : > { %v1249_v41 = vadd.f32 %v1226_v27, %v1170_v39  ;;  %v1250_v42 = vadd.f32 %v1246_v28, %v1190_v40 }
 0x2b9   : > { %v1285_v37 = vpop.f32.mrf.mxu0  ;;  %v1305_v38 = vpop.f32.mrf.mxu1 }
 0x2ba   : > { %v1308_v20 = vadd.f32 %v1285_v37, %v1249_v41  ;;  %v1309_v31 = vadd.f32 %v1305_v38, %v1250_v42  ;;  %v470_v37 = vld [vmem:[%s2543_s9] sm:$0x3] }
 0x2bb   : > { %v471_v38 = vld [vmem:[%s2544_s10] sm:$0x3] }
 0x2bc   : > { %v472_v42 = vld [vmem:[%s2545_s11] sm:$0xff] }
 0x2c0   : > { %v1336_v43 = vpop.f32.mrf.mxu2  ;;  %v1356_v44 = vpop.f32.mrf.mxu3 }
 0x2c1   : > { %v1395_v49 = vpop.f32.mrf.mxu0  ;;  %v1415_v19 = vpop.f32.mrf.mxu1  ;;  %v1359_v32 = vadd.f32 %v1336_v43, %v1308_v20  ;;  %v1360_v50 = vadd.f32 %v1356_v44, %v1309_v31  ;;  %v473_v43 = vld [vmem:[%s2545_s11 + $0x8] sm:$0xff]  ;;  %v474_v44 = vld [vmem:[%s2546_s12] sm:$0xff] }
 0x2c2   : > { %v475_v20 = vld [vmem:[%s2546_s12 + $0x8] sm:$0xff] }
 0x2c3   : > { %v1418_v53 = vadd.f32 %v1395_v49, %v1359_v32  ;;  %v1419_v54 = vadd.f32 %v1415_v19, %v1360_v50 }
 0x2c8   : > { %v1454_v51 = vpop.f32.mrf.mxu2  ;;  %v1474_v52 = vpop.f32.mrf.mxu3 }
 0x2c9   : > { %v1477_v29 = vadd.f32 %v1454_v51, %v1418_v53  ;;  %v1478_v30 = vadd.f32 %v1474_v52, %v1419_v54  ;;  %v1513_v55 = vpop.f32.mrf.mxu0  ;;  %v1533_v56 = vpop.f32.mrf.mxu1 }
 0x2cb   : > { %v1536_v61 = vadd.f32 %v1513_v55, %v1477_v29  ;;  %v1537_v62 = vadd.f32 %v1533_v56, %v1478_v30 }
 0x2d0   : > { %v1572_v63 = vpop.f32.mrf.mxu2  ;;  %v1592_v0 = vpop.f32.mrf.mxu3 }
 0x2d1   : > { %v1595_v1 = vadd.f32 %v1572_v63, %v1536_v61  ;;  %v1596_v6 = vadd.f32 %v1592_v0, %v1537_v62 }
 0x2d3   : > { %v1602_v46 = vadd.f32 %v1600_v7, %v1595_v1  ;;  %v1603_v8 = vadd.f32 %v1600_v7, %v1596_v6 }
 0x2d5   : > { %v1604_v47 = vmax.f32 %v1602_v46, 0.0  ;;  %v1605_v59 = vmax.f32 %v1603_v8, 0.0 }
 0x2d7   : > { %1947 = vmatpush.msk.msrb.mxu0 %vm559_vm2, %v1604_v47  ;;  %1950 = vmatpush.msk.msrb.mxu1 %vm559_vm2, %v1605_v59 }
 0x2d8   : > { %1948 = vmatmul.msk.f32.vlgmr.msrb.gmra.mxu0 %vm555_vm3, %v466_v60  ;;  %1951 = vmatmul.msk.f32.vlgmr.msrb.gmra.mxu1 %vm555_vm3, %v466_v60 }
 0x2e0   : > { %1949 = vmatmul.msk.f32.gmra.mxu0 %vm555_vm3, %v467_v9  ;;  %1952 = vmatmul.msk.f32.gmra.mxu1 %vm555_vm3, %v467_v9 }
 0x355   : > { %v1645_v11 = vpop.f32.mrf.mxu0  ;;  %v1668_v12 = vpop.f32.mrf.mxu1 }
 0x356   : > { %v2487_v15 = vadd.f32 %v1645_v11, %v1609_v10  ;;  %v2489_v57 = vadd.f32 %v1668_v12, %v1609_v10 }
 0x358   : > { %v1674_v58 = vadd.f32 %v2489_v57, %v2487_v15 }
 0x35a   : > { %1675 = vadd.xlane.f32.xlu1 %v1674_v58 }
 0x35d   : > { %v1648_v22 = vpop.f32.mrf.mxu0  ;;  %v1671_v23 = vpop.f32.mrf.mxu1 }
 0x35e   : > { %v2493_v24 = vadd.f32 %v1648_v22, %v1614_v21  ;;  %v2495_v25 = vadd.f32 %v1671_v23, %v1614_v21 }
 0x360   : > { %v1677_v26 = vadd.f32 %v2495_v25, %v2493_v24 }
 0x362   : > { %1678 = vadd.xlane.f32.xlu0 %v1677_v26 }
 0x3cd   : > { %v1676_v13 = vpop.xlane.xlu1 %1675 }
 0x3ce   : > { %v1687_v28 = vmul.f32 %v1686_v18, %v1676_v13 }
 0x3d5   : > { %v1679_v14 = vpop.xlane.xlu0 %1678 }
 0x3d6   : > { %v1688_v27 = vmul.f32 %v1686_v18, %v1679_v14 }
 0x3d8   : > { %1706 = vmatpush.msra.mxu2 %v1688_v27 }
 0x3da   : > { %1707 = vmatpush.msra.mxu2 %v1687_v28 }
 0x3db   : > { %1953 = vmatmul.msk.f32.vlgmr.msra.gmra.mxu2 %vm485_vm0, %v470_v37 }
 0x45e   : > { %v1709_v39 = vpop.f32.mrf.mxu2 }
 0x45f   : > { %v1710_v40 = vadd.f32 %v1709_v39, %v471_v38 }
 0x461   : > { %v1712_v41 = vmax.f32 %v1710_v40, 0.0 }
 0x463   : > { %1954 = vmatpush.msk.msra.mxu3 %vm1720_vm12, %v1712_v41 }
 0x464   : > { %1955 = vmatmul.msk.f32.vlgmr.msra.gmra.mxu3 %vm1713_vm13, %v472_v42 }
 0x46c   : > { %1956 = vmatmul.msk.f32.gmra.mxu3 %vm1713_vm13, %v473_v43 }
 0x4e7   : > { %v1741_v45 = vpop.f32.mrf.mxu3 }
 0x4e8   : > { %v1742_v48 = vadd.f32 %v1741_v45, %v474_v44 }
 0x4ea   : > { %v1747_v49 = vsub.f32 0.0, %v1742_v48 }
 0x4ec   : > { %v1749_v19 = vmul.f32 1.442695, %v1747_v49 }
 0x4ee   : > { %1986 = vpow2.f32 %v1749_v19 }
 0x4ef   : > { %v1744_v31 = vpop.f32.mrf.mxu3 }
 0x4f0   : > { %v1745_v32 = vadd.f32 %v1744_v31, %v475_v20 }
 0x4f2   : > { %v1748_v50 = vsub.f32 0.0, %v1745_v32 }
 0x4f4   : > { %v1987_v51 = vpop.eup %1986  ;;  %v1751_v52 = vmul.f32 1.442695, %v1748_v50 }
 0x4f5   : > { %v1753_v53 = vadd.f32 1.0, %v1987_v51 }
 0x4f6   : > { %1988 = vpow2.f32 %v1751_v52 }
 0x4f7   : > { %1990 = vrcp.f32 %v1753_v53  ;;  %v1766_v61 = vand.u32 2147483648, %v1753_v53  ;;  %v1764_v63 = vand.u32 2147483647, %v1753_v53  ;;  %vm1760_vm15 = vweird.f32 %v1753_v53 }
 0x4f9   : > { %v1767_v6 = vor.u32 1.1754944e-38, %v1766_v61  ;;  %vm1765_vm1 = vcmp.eq.f32.partialorder %v1764_v63, 8.507059e+37 }
 0x4fc   : > { %v1989_v54 = vpop.eup %1988 }
 0x4fd   : > { %v1991_v29 = vpop.eup %1990  ;;  %v1754_v30 = vadd.f32 1.0, %v1989_v54 }
 0x4fe   : > { %v1756_v55 = vmul.f32 %v1991_v29, %v1753_v53  ;;  %vm1761_vm14 = vweird.f32 %v1991_v29 }
 0x4ff   : > { %1992 = vrcp.f32 %v1754_v30  ;;  %vm1762_vm0 = vmor %vm1760_vm15, %vm1761_vm14  ;;  %v1780_v59 = vand.u32 2147483648, %v1754_v30  ;;  %v1778_v9 = vand.u32 2147483647, %v1754_v30  ;;  %vm1774_vm3 = vweird.f32 %v1754_v30 }
 0x500   : > { %v1757_v56 = vsub.f32 1.0, %v1756_v55 }
 0x501   : > { %v1781_v11 = vor.u32 1.1754944e-38, %v1780_v59  ;;  %vm1779_vm5 = vcmp.eq.f32.partialorder %v1778_v9, 8.507059e+37 }
 0x502   : > { %v1758_v62 = vmul.f32 %v1991_v29, %v1757_v56 }
 0x504   : > { %v1759_v0 = vadd.f32 %v1991_v29, %v1758_v62 }
 0x505   : > { %v1993_v1 = vpop.eup %1992 }
 0x506   : > { %v1763_v7 = vsel %vm1762_vm0, %v1991_v29, %v1759_v0  ;;  %v1770_v46 = vmul.f32 %v1993_v1, %v1754_v30  ;;  %vm1775_vm2 = vweird.f32 %v1993_v1 }
 0x507   : > { %v1768_v8 = vsel %vm1765_vm1, %v1767_v6, %v1763_v7  ;;  %vm1776_vm4 = vmor %vm1774_vm3, %vm1775_vm2 }
 0x508   : > { %1785 = vperm.xlu2 %1981, %v1768_v8   ;;  %v1771_v47 = vsub.f32 1.0, %v1770_v46 }
 0x50a   : > { %v1772_v60 = vmul.f32 %v1993_v1, %v1771_v47 }
 0x50c   : > { %v1773_v10 = vadd.f32 %v1993_v1, %v1772_v60 }
 0x50e   : > { %v1777_v12 = vsel %vm1776_vm4, %v1993_v1, %v1773_v10 }
 0x50f   : > { %v1782_v58 = vsel %vm1779_vm5, %v1781_v11, %v1777_v12 }
 0x510   : > { %1790 = vperm.xlu2 %1981, %v1782_v58  }
 0x562   : > { %v1786_v21 = vpop.permute.xlu2 %1785 }
 0x563   : > { %v1793_v22 = vmul.f32 %v1786_v21, %v2487_v15  ;;  %v1794_v23 = vmul.f32 %v1786_v21, %v2489_v57 }
 0x565   : > { %v1797_v26 = vadd.f32 %v1793_v22, %v2105_v4  ;;  %v1798_v33 = vadd.f32 %v1794_v23, %v2109_v5 }
 0x567   : > { %v1801_v34 = vmax.f32 %v1797_v26, 0.0  ;;  %v1802_v35 = vmax.f32 %v1798_v33, 0.0 }
 0x569   : > { %1805 = vst [vmem:[%s440_s18] sm:$0xff] %v1801_v34 }
 0x56a   : > { %1806 = vst [vmem:[%s440_s18 + $0x8] sm:$0xff] %v1802_v35  ;;  %v1791_v36 = vpop.permute.xlu2 %1790 }
 0x56b   : > { %v1795_v16 = vmul.f32 %v1791_v36, %v2493_v24  ;;  %v1796_v15 = vmul.f32 %v1791_v36, %v2495_v25 }
 0x56d   : > { %v1799_v57 = vadd.f32 %v1795_v16, %v2101_v2  ;;  %v1800_v4 = vadd.f32 %v1796_v15, %v2103_v3 }
 0x56f   : > { %v1803_v17 = vmax.f32 %v1799_v57, 0.0  ;;  %v1804_v5 = vmax.f32 %v1800_v4, 0.0 }
 0x571   : > { %1807 = vst [vmem:[%s440_s18 + $0x10] sm:$0xff] %v1803_v17 }
 0x572   : > { %1808 = vst [vmem:[%s440_s18 + $0x18] sm:$0xff] %v1804_v5 }
 0x573 PF: > { %s23_s25 = sadd.s32 1, %s2000_s25  }
 0x574   : > { %p20_p4 = scmp.ge.s32.totalorder %s23_s25, 4  }
 0x576   :  { %22 = sbr.rel (!%p20_p4) target bundleno = 1 (0x1), region = 102 }

</bundles_post_ra>
